<compile_context>
chip_gen: v6e
topology: v6e:2x2x1
jax: 0.10.0
libtpu: 0.0.40
codegen_flags: <defaults>
</compile_context>

<pallas_src>
import jax
import jax.numpy as jnp
from jax.experimental import pallas as pl
from jax.experimental.pallas import tpu as pltpu


def _round_up(x, m):
    return (x + m - 1) // m * m


def _cdiv(a, b):
    return (a + b - 1) // b


# ----------------------------------------------------------------------------
# Kernel
# ----------------------------------------------------------------------------
def _mlp_kernel(x_ref, w1_ref, b1_ref, w2_ref, b2_ref, o_ref, acc_ref):
    # Grid = (batch tiles, K tiles over the flattened feature dim); K axis last.
    # x_ref:  (tm, tk)  bf16      w1_ref: (tk, Hp) bf16    b1_ref: (1, Hp) f32
    # w2_ref: (Hp, Ap)  bf16      b2_ref: (1, Ap)  f32
    # o_ref:  (tm, Ap)  f32       acc_ref: (tm, Hp) f32 scratch
    k = pl.program_id(1)

    @pl.when(k == 0)
    def _init():
        acc_ref[...] = jnp.zeros_like(acc_ref)

    # Layer-1 partial matmul on the MXU: bf16 operands, f32 accumulation.
    acc_ref[...] += jnp.dot(x_ref[...], w1_ref[...],
                            preferred_element_type=jnp.float32)

    @pl.when(k == pl.num_programs(1) - 1)
    def _finalize():
        h = jnp.maximum(acc_ref[...] + b1_ref[...], 0.0)          # bias + ReLU (VPU)
        out = jnp.dot(h.astype(w2_ref.dtype), w2_ref[...],        # layer-2 on MXU
                      preferred_element_type=jnp.float32)
        o_ref[...] = (out + b2_ref[...]).astype(o_ref.dtype)      # lane-dense store


# ----------------------------------------------------------------------------
# Per-chip tiling policy
# ----------------------------------------------------------------------------
def _device_defaults():
    try:
        kind = jax.devices()[0].device_kind.lower()
    except Exception:  # pragma: no cover
        kind = ""
    if "7" in kind:
        # v7x: 64 MiB physical VMEM per TC, 2 TCs -> bounded K tiles, force >=2
        # batch tiles (when B allows) so both cores get work.
        return dict(block_m=256, block_k=4096,
                    vmem_cap=48 * 1024 * 1024, min_m_tiles=2)
    # v5e / v6e (128 MiB VMEM): keep w1 fully resident up to very large F.
    return dict(block_m=512, block_k=16384,
                vmem_cap=96 * 1024 * 1024, min_m_tiles=1)


def _vmem_estimate(tm, tk, h_pad, a_pad):
    return (2 * tm * tk * 2            # x tile, double-buffered, bf16
            + 2 * tk * h_pad * 2       # w1 tile, double-buffered, bf16
            + 2 * h_pad * a_pad * 2    # w2 (resident, 2 bufs), bf16
            + 2 * (h_pad + a_pad) * 4  # biases
            + tm * h_pad * 4           # f32 accumulator scratch
            + 2 * tm * a_pad * 4)      # output tile, double-buffered, f32


# ----------------------------------------------------------------------------
# One-time weight preparation (cast + pad, cached across forward calls)
# ----------------------------------------------------------------------------
def prepare_params(w1, b1, w2, b2):
    """Cast weights to bf16, pad to lane/sublane-friendly shapes, pick tiles."""
    F, H = w1.shape
    A = w2.shape[1]
    cfg = _device_defaults()
    block_m, block_k = cfg["block_m"], cfg["block_k"]
    vmem_cap, min_m_tiles = cfg["vmem_cap"], cfg["min_m_tiles"]

    LANE = 128
    H_pad = _round_up(H, LANE)
    A_pad = _round_up(A, LANE)                      # lane-dense output / MXU N
    F_pad = _round_up(F, LANE)

    # Shrink block_k / block_m until the worst-case working set fits the budget.
    while (_vmem_estimate(block_m, min(F_pad, block_k), H_pad, A_pad)
           > 0.8 * vmem_cap) and (block_k > 512 or block_m > 64):
        if block_k > 512:
            block_k //= 2
        else:
            block_m //= 2

    # Balanced K tiles (no rounding of F up to block_k).
    if F_pad <= block_k:
        tk, n_k = F_pad, 1                          # w1 fully VMEM-resident
    else:
        n_k = _cdiv(F_pad, block_k)
        tk = _round_up(_cdiv(F_pad, n_k), 256)
        F_pad = n_k * tk

    w1p = jnp.zeros((F_pad, H_pad), jnp.bfloat16).at[:F, :H].set(
        jnp.asarray(w1).astype(jnp.bfloat16))
    w2p = jnp.zeros((H_pad, A_pad), jnp.bfloat16).at[:H, :A].set(
        jnp.asarray(w2).astype(jnp.bfloat16))
    b1p = jnp.zeros((1, H_pad), jnp.float32).at[:, :H].set(
        jnp.asarray(b1, jnp.float32).reshape(1, H))
    b2p = jnp.zeros((1, A_pad), jnp.float32).at[:, :A].set(
        jnp.asarray(b2, jnp.float32).reshape(1, A))

    return dict(w1p=w1p, b1p=b1p, w2p=w2p, b2p=b2p,
                F=F, H=H, A=A, F_pad=F_pad, H_pad=H_pad, A_pad=A_pad,
                tk=tk, n_k=n_k, block_m=block_m, min_m_tiles=min_m_tiles,
                vmem_cap=vmem_cap)


# ----------------------------------------------------------------------------
# Forward
# ----------------------------------------------------------------------------
def base_forward(x, prep):
    """x: (B, C, H, W) float32. Returns (B, num_actions) float32."""
    B = x.shape[0]
    x_flat = x.reshape(B, -1)                       # == torch x.view(x.size(0), -1)
    F = x_flat.shape[1]
    assert F == prep["F"], "flattened feature dim mismatch with prepared weights"

    F_pad, H_pad, A_pad = prep["F_pad"], prep["H_pad"], prep["A_pad"]
    tk, n_k = prep["tk"], prep["n_k"]
    A = prep["A"]

    # Balanced batch tiles; bf16 sublane granule is 16.
    SUB = 16
    n_m = _cdiv(B, prep["block_m"])
    if n_m == 1 and prep["min_m_tiles"] > 1 and B >= 2 * SUB:
        n_m = prep["min_m_tiles"]                   # shard batch across v7x cores
    tm = _round_up(_cdiv(B, n_m), SUB)
    B_pad = n_m * tm

    # Pad / cast activations (only when needed).
    xb = x_flat.astype(jnp.bfloat16)
    if B_pad != B or F_pad != F:
        xb = jnp.pad(xb, ((0, B_pad - B), (0, F_pad - F)))

    grid = (n_m, n_k)

    # Scheduler hint reflecting real HBM traffic (w1 re-streamed per batch tile
    # only when K-tiled; fetched once when resident).
    w1_reads = n_m if n_k > 1 else 1
    cost = pl.CostEstimate(
        flops=2 * B_pad * F_pad * H_pad + 2 * B_pad * H_pad * A_pad,
        transcendentals=0,
        bytes_accessed=(B_pad * F_pad * 2
                        + F_pad * H_pad * 2 * w1_reads
                        + H_pad * A_pad * 2
                        + (H_pad + A_pad) * 4
                        + B_pad * A_pad * 4),
    )

    out = pl.pallas_call(
        _mlp_kernel,
        out_shape=jax.ShapeDtypeStruct((B_pad, A_pad), jnp.float32),
        grid_spec=pltpu.PrefetchScalarGridSpec(
            num_scalar_prefetch=0,
            grid=grid,
            in_specs=[
                pl.BlockSpec((tm, tk), lambda m, k: (m, k)),        # x tile
                pl.BlockSpec((tk, H_pad), lambda m, k: (k, 0)),     # w1 K-tile
                pl.BlockSpec((1, H_pad), lambda m, k: (0, 0)),      # b1 (resident)
                pl.BlockSpec((H_pad, A_pad), lambda m, k: (0, 0)),  # w2 (resident)
                pl.BlockSpec((1, A_pad), lambda m, k: (0, 0)),      # b2 (resident)
            ],
            out_specs=pl.BlockSpec((tm, A_pad), lambda m, k: (m, 0)),
            scratch_shapes=[pltpu.VMEM((tm, H_pad), jnp.float32)],
        ),
        compiler_params=pltpu.CompilerParams(
            dimension_semantics=("parallel", "arbitrary"),
            vmem_limit_bytes=prep["vmem_cap"],
        ),
        cost_estimate=cost,
    )(xb, prep["w1p"], prep["b1p"], prep["w2p"], prep["b2p"])

    return out[:B, :A]


# ----------------------------------------------------------------------------
# Init + self-test
# ----------------------------------------------------------------------------
def init_params(key, feat_dim, hidden_dim, num_actions):
    """Deterministic PyTorch-Linear-style init (uniform +-1/sqrt(fan_in)),
    weights stored as (in_features, out_features)."""
    k1, k2, k3, k4 = jax.random.split(key, 4)
    bound1 = 1.0 / jnp.sqrt(feat_dim)
    bound2 = 1.0 / jnp.sqrt(hidden_dim)
    w1 = jax.random.uniform(k1, (feat_dim, hidden_dim), jnp.float32, -bound1, bound1)
    b1 = jax.random.uniform(k2, (1, hidden_dim), jnp.float32, -bound1, bound1)
    w2 = jax.random.uniform(k3, (hidden_dim, num_actions), jnp.float32, -bound2, bound2)
    b2 = jax.random.uniform(k4, (1, num_actions), jnp.float32, -bound2, bound2)
    return w1, b1, w2, b2


if __name__ == "__main__":
    # Small shapes consistent with the module: input_shape=(4,16,16), num_actions=8
    B, C, Hh, Ww = 2, 4, 16, 16
    num_actions = 8
    hidden_dim = 128
    feat_dim = C * Hh * Ww  # 1024

    key = jax.random.PRNGKey(0)
    kx, kp = jax.random.split(key)
    x = jax.random.normal(kx, (B, C, Hh, Ww), jnp.float32)
    w1, b1, w2, b2 = init_params(kp, feat_dim, hidden_dim, num_actions)

    prep = prepare_params(w1, b1, w2, b2)           # one-time cast + pad
    out = base_forward(x, prep)
    jax.block_until_ready(out)
    assert out.shape == (B, num_actions)

    # Reference with the same bf16-matmul / f32-accumulate numerics as the kernel.
    x_flat = x.reshape(B, -1)
    h_ref = jnp.maximum(
        jnp.dot(x_flat.astype(jnp.bfloat16), w1.astype(jnp.bfloat16),
                preferred_element_type=jnp.float32) + b1, 0.0)
    ref_bf16 = jnp.dot(h_ref.astype(jnp.bfloat16), w2.astype(jnp.bfloat16),
                       preferred_element_type=jnp.float32) + b2
    assert jnp.allclose(out, ref_bf16, atol=1e-2, rtol=1e-2)

    # Loose check against the pure-f32 PyTorch-equivalent forward.
    ref_f32 = jnp.maximum(x_flat @ w1 + b1, 0.0) @ w2 + b2
    assert jnp.allclose(out, ref_f32, atol=5e-2, rtol=5e-2)

    print("KERNEL_OK")
</pallas_src>

<mosaic_0001>
module attributes {stable_mosaic.version = 11 : i64} {
  func.func @_mlp_kernel(%arg0: i32, %arg1: i32, %arg2: memref<16x1024xbf16, #tpu.memory_space<vmem>>, %arg3: memref<1024x128xbf16, #tpu.memory_space<vmem>>, %arg4: memref<1x128xf32, #tpu.memory_space<vmem>>, %arg5: memref<128x128xbf16, #tpu.memory_space<vmem>>, %arg6: memref<1x128xf32, #tpu.memory_space<vmem>>, %arg7: memref<16x128xf32, #tpu.memory_space<vmem>>, %arg8: memref<16x128xf32, #tpu.memory_space<vmem>>) attributes {dimension_semantics = [#tpu.dimension_semantics<parallel>, #tpu.dimension_semantics<arbitrary>], iteration_bounds = array<i64: 1, 1>, scalar_prefetch = 0 : i64, scratch_operands = 1 : i64, tpu.core_type = #tpu.core_type<tc>, window_params = [{transform_indices = @transform_0, window_bounds = array<i64: 16, 1024>}, {transform_indices = @transform_1, window_bounds = array<i64: 1024, 128>}, {pipeline_mode = #tpu.pipeline_mode<synchronous>, transform_indices = @transform_2, window_bounds = array<i64: 1, 128>}, {pipeline_mode = #tpu.pipeline_mode<synchronous>, transform_indices = @transform_3, window_bounds = array<i64: 128, 128>}, {pipeline_mode = #tpu.pipeline_mode<synchronous>, transform_indices = @transform_4, window_bounds = array<i64: 1, 128>}, {transform_indices = @transform_5, window_bounds = array<i64: 16, 128>}]} {
    %c0_i32 = arith.constant 0 : i32
    %0 = arith.cmpi eq, %arg1, %c0_i32 : i32
    %1 = arith.extui %0 : i1 to i32
    %c0_i32_0 = arith.constant 0 : i32
    %2 = arith.cmpi ne, %1, %c0_i32_0 : i32
    scf.if %2 {
      %cst_10 = arith.constant 0.000000e+00 : f32
      %12 = vector.broadcast %cst_10 : f32 to vector<16x128xf32>
      %c0_11 = arith.constant 0 : index
      %c0_12 = arith.constant 0 : index
      %13 = vector.load %arg8[%c0_11, %c0_12] : memref<16x128xf32, #tpu.memory_space<vmem>>, vector<16x128xf32>
      tpu.vector_store %arg8[%c0_11, %c0_12], %12 {strides = array<i32>} : memref<16x128xf32, #tpu.memory_space<vmem>>, vector<16x128xf32>,
    } else {
    }
    %c0 = arith.constant 0 : index
    %c0_1 = arith.constant 0 : index
    %3 = vector.load %arg8[%c0, %c0_1] : memref<16x128xf32, #tpu.memory_space<vmem>>, vector<16x128xf32>
    %c0_2 = arith.constant 0 : index
    %c0_3 = arith.constant 0 : index
    %4 = vector.load %arg2[%c0_2, %c0_3] : memref<16x1024xbf16, #tpu.memory_space<vmem>>, vector<16x1024xbf16>
    %c0_4 = arith.constant 0 : index
    %c0_5 = arith.constant 0 : index
    %5 = vector.load %arg3[%c0_4, %c0_5] : memref<1024x128xbf16, #tpu.memory_space<vmem>>, vector<1024x128xbf16>
    %cst = arith.constant dense<0.000000e+00> : vector<16x128xf32>
    %6 = tpu.matmul %4, %5, %cst {dimension_numbers = #tpu.dot_dimension_numbers<[1], [0], [0], [1], [0, 0, 1, 1], [], []>} : vector<16x1024xbf16>, vector<1024x128xbf16>, vector<16x128xf32> -> vector<16x128xf32>
    %7 = arith.addf %3, %6 : vector<16x128xf32>
    %c0_6 = arith.constant 0 : index
    %c0_7 = arith.constant 0 : index
    %8 = vector.load %arg8[%c0_6, %c0_7] : memref<16x128xf32, #tpu.memory_space<vmem>>, vector<16x128xf32>
    tpu.vector_store %arg8[%c0_6, %c0_7], %7 {strides = array<i32>} : memref<16x128xf32, #tpu.memory_space<vmem>>, vector<16x128xf32>,
    %c0_i32_8 = arith.constant 0 : i32
    %9 = arith.cmpi eq, %arg1, %c0_i32_8 : i32
    %10 = arith.extui %9 : i1 to i32
    %c0_i32_9 = arith.constant 0 : i32
    %11 = arith.cmpi ne, %10, %c0_i32_9 : i32
    scf.if %11 {
      %c0_10 = arith.constant 0 : index
      %c0_11 = arith.constant 0 : index
      %12 = vector.load %arg8[%c0_10, %c0_11] : memref<16x128xf32, #tpu.memory_space<vmem>>, vector<16x128xf32>
      %c0_12 = arith.constant 0 : index
      %c0_13 = arith.constant 0 : index
      %13 = vector.load %arg4[%c0_12, %c0_13] : memref<1x128xf32, #tpu.memory_space<vmem>>, vector<1x128xf32>
      %14 = vector.broadcast %13 : vector<1x128xf32> to vector<16x128xf32>
      %15 = arith.addf %12, %14 : vector<16x128xf32>
      %cst_14 = arith.constant 0.000000e+00 : f32
      %16 = vector.broadcast %cst_14 : f32 to vector<16x128xf32>
      %17 = arith.maximumf %15, %16 : vector<16x128xf32>
      %18 = arith.truncf %17 : vector<16x128xf32> to vector<16x128xbf16>
      %c0_15 = arith.constant 0 : index
      %c0_16 = arith.constant 0 : index
      %19 = vector.load %arg5[%c0_15, %c0_16] : memref<128x128xbf16, #tpu.memory_space<vmem>>, vector<128x128xbf16>
      %cst_17 = arith.constant dense<0.000000e+00> : vector<16x128xf32>
      %20 = tpu.matmul %18, %19, %cst_17 {dimension_numbers = #tpu.dot_dimension_numbers<[1], [0], [0], [1], [0, 0, 1, 1], [], []>} : vector<16x128xbf16>, vector<128x128xbf16>, vector<16x128xf32> -> vector<16x128xf32>
      %c0_18 = arith.constant 0 : index
      %c0_19 = arith.constant 0 : index
      %21 = vector.load %arg6[%c0_18, %c0_19] : memref<1x128xf32, #tpu.memory_space<vmem>>, vector<1x128xf32>
      %22 = vector.broadcast %21 : vector<1x128xf32> to vector<16x128xf32>
      %23 = arith.addf %20, %22 : vector<16x128xf32>
      %c0_20 = arith.constant 0 : index
      %c0_21 = arith.constant 0 : index
      %24 = vector.load %arg7[%c0_20, %c0_21] : memref<16x128xf32, #tpu.memory_space<vmem>>, vector<16x128xf32>
      tpu.vector_store %arg7[%c0_20, %c0_21], %23 {strides = array<i32>} : memref<16x128xf32, #tpu.memory_space<vmem>>, vector<16x128xf32>,
    } else {
    }
    return
  }
  func.func @transform_0(%arg0: i32, %arg1: i32) -> (i32, i32) {
    %c0_i32 = arith.constant 0 : i32
    return %arg0, %arg1 : i32, i32
  }
  func.func @transform_1(%arg0: i32, %arg1: i32) -> (i32, i32) {
    %c0_i32 = arith.constant 0 : i32
    %c0_i32_0 = arith.constant 0 : i32
    return %arg1, %c0_i32 : i32, i32
  }
  func.func @transform_2(%arg0: i32, %arg1: i32) -> (i32, i32) {
    %c0_i32 = arith.constant 0 : i32
    %c0_i32_0 = arith.constant 0 : i32
    %c0_i32_1 = arith.constant 0 : i32
    return %c0_i32, %c0_i32_0 : i32, i32
  }
  func.func @transform_3(%arg0: i32, %arg1: i32) -> (i32, i32) {
    %c0_i32 = arith.constant 0 : i32
    %c0_i32_0 = arith.constant 0 : i32
    %c0_i32_1 = arith.constant 0 : i32
    return %c0_i32, %c0_i32_0 : i32, i32
  }
  func.func @transform_4(%arg0: i32, %arg1: i32) -> (i32, i32) {
    %c0_i32 = arith.constant 0 : i32
    %c0_i32_0 = arith.constant 0 : i32
    %c0_i32_1 = arith.constant 0 : i32
    return %c0_i32, %c0_i32_0 : i32, i32
  }
  func.func @transform_5(%arg0: i32, %arg1: i32) -> (i32, i32) {
    %c0_i32 = arith.constant 0 : i32
    %c0_i32_0 = arith.constant 0 : i32
    return %arg0, %c0_i32 : i32, i32
  }
}

</mosaic_0001>

<bundles_post_ra>
// kernel: tpu_custom_call.1
= control target key start
LH: loop header
LB: loop body
LE: loop exit
PB: predicated region body
PF: predicated region fallthrough
CT: control target
= control target key end

     0   :  { %10 = vsyncpa [#allocation4], 0  ;;  %s1377_s0 = inlined_call_operand.hbm [shape: bf16[16,1024], index: 0, kind: input, shape index: {}]   ;;  %s1378_s1 = inlined_call_operand.hbm [shape: bf16[1024,128], index: 1, kind: input, shape index: {}]   ;;  %s1379_s2 = inlined_call_operand.vmem [shape: f32[1,128], index: 2, kind: input, shape index: {}]   ;;  %s1380_s3 = inlined_call_operand.hbm [shape: bf16[128,128], index: 3, kind: input, shape index: {}]   ;;  %s1381_s4 = inlined_call_operand.vmem [shape: f32[1,128], index: 4, kind: input, shape index: {}]   ;;  %s1382_s5 = inlined_call_operand.hbm [shape: f32[16,128], index: 5, kind: output, shape index: {}]  }
   0x1   :  { %11 = vsyncpa [#allocation7], 0 }
   0x2   :  { %12 = vsyncpa [#allocation5], 0  ;;  %s1317_s18 = smov [#allocation6]  }
   0x3   :  { %s30_s19 = sshll.u32 %s1317_s18, 4  ;;  %s31_s19 = int_to_ptr.vmem [resolvable:$true] %s30_s19 }
   0x4   :  { %s1239_s20 = scalar_lea.vmem %s31_s19, 8192  ;;  %p1244_p1 = scmp.lt.s32.totalorder %s31_s19, %s31_s19 }
   0x5   :  { %p1240_p0 = scmp.ne.s32.totalorder %s31_s19, %s1239_s20  ;;  %p1245_p2 = scmp.lt.s32.totalorder %s1239_s20, %s1239_s20 }
   0x7   :  { %p1246_p3 = por %p1245_p2, %p1244_p1 }
   0x9   :  { %p1247_p4 = pnand %p1246_p3, %p1240_p0 }
   0xb   :  { %1250 = shalt.err (!%p1247_p4)
}
   0xc   :  { %s1318_s21 = smov 64   ;;  %s1319_s22 = smov 4  }
   0xd   :  { %36 = dma.hbm_to_vmem [thread:$0]  %s1378_s1, 8192, %s31_s19, [#allocation7], %s1318_s21, %s1318_s21, %s1319_s22  }
   0xe   :  { %s1320_s25 = smov [#allocation3]  }
   0xf   :  { %s18_s26 = sshll.u32 %s1320_s25, 4  ;;  %s19_s26 = int_to_ptr.vmem [resolvable:$true] %s18_s26 }
  0x10   :  { %s1259_s27 = scalar_lea.vmem %s19_s26, 1024  ;;  %p1264_p6 = scmp.lt.s32.totalorder %s19_s26, %s19_s26 }
  0x11   :  { %p1260_p5 = scmp.ne.s32.totalorder %s19_s26, %s1259_s27  ;;  %p1265_p7 = scmp.lt.s32.totalorder %s1259_s27, %s1259_s27 }
  0x13   :  { %p1266_p8 = por %p1265_p7, %p1264_p6 }
  0x15   :  { %p1267_p9 = pnand %p1266_p8, %p1260_p5 }
  0x17   :  { %1270 = shalt.err (!%p1267_p9)
}
  0x18   :  { %s1321_s28 = smov 512   ;;  %s1322_s29 = smov 32  }
  0x19   :  { %24 = dma.hbm_to_vmem [thread:$0]  %s1377_s0, 1024, %s19_s26, [#allocation4], %s1321_s28, %s1321_s28, %s1322_s29  }
  0x1a   :  { %s1323_s7 = smov [#allocation8]  }
  0x1b   :  { %s44_s8 = sshll.u32 %s1323_s7, 4  ;;  %s45_s8 = int_to_ptr.vmem [resolvable:$true] %s44_s8 }
  0x1c   :  { %s1279_s1 = scalar_lea.vmem %s45_s8, 1024  ;;  %p1284_p11 = scmp.lt.s32.totalorder %s45_s8, %s45_s8 }
  0x1d   :  { %p1280_p10 = scmp.ne.s32.totalorder %s45_s8, %s1279_s1  ;;  %p1285_p12 = scmp.lt.s32.totalorder %s1279_s1, %s1279_s1 }
  0x1f   :  { %p1286_p13 = por %p1285_p12, %p1284_p11 }
  0x21   :  { %p1287_p0 = pnand %p1286_p13, %p1280_p10 }
  0x23   :  { %1290 = shalt.err (!%p1287_p0)
}
  0x24   :  { %50 = dma.hbm_to_vmem [thread:$0]  %s1380_s3, 1024, %s45_s8, [#allocation7], %s1318_s21, %s1318_s21, %s1319_s22  }
  0x25   :  { %1311 = dma.done.wait [#allocation4], 1024  }
  0x26   :  { %1312 = vsyncadd [#allocation4], 4294966272 }
  0x27   :  { %1313 = dma.done.wait [#allocation7], 9216  }
  0x28   :  { %1314 = vsyncadd [#allocation7], 4294958080  ;;  %v1159_v0 = vld [vmem:[#allocation6 + $0x78] sm:$0xff]   ;;  %v1163_v4 = vld [vmem:[#allocation6 + $0x70] sm:$0xff]   ;;  %vm1325_vm0 = vmmov 0   ;;  %s1326_s13 = smov [#allocation9]  }
  0x29   :  { %v1160_v1 = vld [vmem:[#allocation6 + $0xf8] sm:$0xff]   ;;  %1030 = vmatprep.subr.bf16.mxu0 %v1159_v0  ;;  %v1164_v5 = vld [vmem:[#allocation6 + $0xf0] sm:$0xff]   ;;  %v1167_v8 = vld [vmem:[#allocation6 + $0x68] sm:$0xff]   ;;  %s935_s14 = sshll.u32 %s1326_s13, 4  ;;  %s936_s14 = int_to_ptr.vmem [resolvable:$true] %s935_s14 }
  0x2a   :  { %v1161_v2 = vld [vmem:[#allocation6 + $0x38] sm:$0xff]   ;;  %1052 = vmatprep.subr.bf16.mxu1 %v1160_v1  ;;  %v1165_v6 = vld [vmem:[#allocation6 + $0x30] sm:$0xff]   ;;  %v1168_v9 = vld [vmem:[#allocation6 + $0xe8] sm:$0xff]   ;;  %p1296_p2 = scmp.lt.s32.totalorder %s936_s14, %s936_s14 }
  0x2b   :  { %v1162_v3 = vld [vmem:[#allocation6 + $0xb8] sm:$0xff]   ;;  %1031 = vmatpush3.bf16.msra.mxu0 %v1161_v2  ;;  %v1166_v7 = vld [vmem:[#allocation6 + $0xb0] sm:$0xff]   ;;  %v1169_v10 = vld [vmem:[#allocation6 + $0x28] sm:$0xff]  }
  0x2c   :  { %1053 = vmatpush3.bf16.msra.mxu1 %v1162_v3  ;;  %1032 = vmatprep.subr.bf16.mxu0 %v1163_v4  ;;  %v1170_v11 = vld [vmem:[#allocation6 + $0xa8] sm:$0xff]   ;;  %v1171_v12 = vld [vmem:[#allocation6 + $0x60] sm:$0xff]   ;;  %v1175_v16 = vld [vmem:[#allocation6 + $0x58] sm:$0xff]  }
  0x2d   :  { %1054 = vmatprep.subr.bf16.mxu1 %v1164_v5  ;;  %v1172_v13 = vld [vmem:[#allocation6 + $0xe0] sm:$0xff]   ;;  %v1176_v17 = vld [vmem:[#allocation6 + $0xd8] sm:$0xff]   ;;  %v1179_v20 = vld [vmem:[#allocation6 + $0x50] sm:$0xff]  }
  0x2e   :  { %v1173_v14 = vld [vmem:[#allocation6 + $0x20] sm:$0xff]   ;;  %v1177_v18 = vld [vmem:[#allocation6 + $0x18] sm:$0xff]   ;;  %v1180_v21 = vld [vmem:[#allocation6 + $0xd0] sm:$0xff]  }
  0x2f   :  { %1033 = vmatpush3.bf16.msra.mxu0 %v1165_v6  ;;  %v1174_v15 = vld [vmem:[#allocation6 + $0xa0] sm:$0xff]   ;;  %v1178_v19 = vld [vmem:[#allocation6 + $0x98] sm:$0xff]   ;;  %v1181_v22 = vld [vmem:[#allocation6 + $0x10] sm:$0xff]  }
  0x30   :  { %1055 = vmatpush3.bf16.msra.mxu1 %v1166_v7  ;;  %1034 = vmatprep.subr.bf16.mxu0 %v1167_v8  ;;  %v1182_v23 = vld [vmem:[#allocation6 + $0x90] sm:$0xff]   ;;  %v1183_v24 = vld [vmem:[#allocation6 + $0x48] sm:$0xff]   ;;  %v1187_v28 = vld [vmem:[#allocation6 + $0x40] sm:$0xff]  }
  0x31   :  { %1056 = vmatprep.subr.bf16.mxu1 %v1168_v9  ;;  %v1184_v25 = vld [vmem:[#allocation6 + $0xc8] sm:$0xff]   ;;  %v1188_v29 = vld [vmem:[#allocation6 + $0xc0] sm:$0xff]   ;;  %v1191_v40 = vld [vmem:[#allocation6 + $0x178] sm:$0xff]  }
  0x32   :  { %v1185_v26 = vld [vmem:[#allocation6 + $0x8] sm:$0xff]   ;;  %v1189_v30 = vld [vmem:[#allocation6] sm:$0xff]   ;;  %v1192_v41 = vld [vmem:[#allocation6 + $0x1f8] sm:$0xff]  }
  0x33   :  { %1035 = vmatpush3.bf16.msra.mxu0 %v1169_v10  ;;  %v1186_v27 = vld [vmem:[#allocation6 + $0x88] sm:$0xff]   ;;  %v1190_v31 = vld [vmem:[#allocation6 + $0x80] sm:$0xff]   ;;  %v1193_v42 = vld [vmem:[#allocation6 + $0x138] sm:$0xff]  }
  0x34   :  { %1057 = vmatpush3.bf16.msra.mxu1 %v1170_v11  ;;  %1036 = vmatprep.subr.bf16.mxu0 %v1171_v12  ;;  %v71_v32 = vld [vmem:[#allocation3] sm:$0xff]  ;;  %v72_v34 = vld [vmem:[#allocation3 + $0x8] sm:$0xff]  ;;  %v1194_v43 = vld [vmem:[#allocation6 + $0x1b8] sm:$0xff]  }
  0x35   :  { %1058 = vmatprep.subr.bf16.mxu1 %v1172_v13  ;;  %v75_v33 = vld [vmem:[#allocation3 + $0x20] sm:$0xff]  ;;  %v76_v37 = vld [vmem:[#allocation3 + $0x28] sm:$0xff]  ;;  %v1195_v44 = vld [vmem:[#allocation6 + $0x170] sm:$0xff]  }
  0x36   :  { %v948_v35 = vcombine.low %v71_v32, %v75_v33  ;;  %v949_v36 = vcombine.high %v71_v32, %v75_v33  ;;  %v950_v38 = vcombine.low %v72_v34, %v76_v37  ;;  %v951_v39 = vcombine.high %v72_v34, %v76_v37  ;;  %v1196_v45 = vld [vmem:[#allocation6 + $0x1f0] sm:$0xff]   ;;  %v1199_v48 = vld [vmem:[#allocation6 + $0x168] sm:$0xff]   ;;  %v1203_v52 = vld [vmem:[#allocation6 + $0x160] sm:$0xff]  }
  0x37   :  { %1037 = vmatpush3.bf16.msra.mxu0 %v1173_v14  ;;  %v1197_v46 = vld [vmem:[#allocation6 + $0x130] sm:$0xff]   ;;  %v1200_v49 = vld [vmem:[#allocation6 + $0x1e8] sm:$0xff]   ;;  %v1204_v53 = vld [vmem:[#allocation6 + $0x1e0] sm:$0xff]  }
  0x38   :  { %1059 = vmatpush3.bf16.msra.mxu1 %v1174_v15  ;;  %1038 = vmatprep.subr.bf16.mxu0 %v1175_v16  ;;  %v1198_v47 = vld [vmem:[#allocation6 + $0x1b0] sm:$0xff]   ;;  %v1201_v50 = vld [vmem:[#allocation6 + $0x128] sm:$0xff]   ;;  %v1205_v54 = vld [vmem:[#allocation6 + $0x120] sm:$0xff]  }
  0x39   :  { %1060 = vmatprep.subr.bf16.mxu1 %v1176_v17  ;;  %663 = vmatprep.mubr.bf16.mxu0 %v949_v36  ;;  %v1202_v51 = vld [vmem:[#allocation6 + $0x1a8] sm:$0xff]   ;;  %v1206_v55 = vld [vmem:[#allocation6 + $0x1a0] sm:$0xff]   ;;  %v1207_v56 = vld [vmem:[#allocation6 + $0x158] sm:$0xff]   ;;  %v1324_v17 = vmov 0.0  }
  0x3a   :  { %704 = vmatprep.mubr.bf16.mxu1 %v951_v39  ;;  %v1208_v57 = vld [vmem:[#allocation6 + $0x1d8] sm:$0xff]   ;;  %v1211_v60 = vld [vmem:[#allocation6 + $0x150] sm:$0xff]   ;;  %v1215_v0 = vld [vmem:[#allocation6 + $0x148] sm:$0xff]  }
  0x3b   :  { %1039 = vmatpush3.bf16.msra.mxu0 %v1177_v18  ;;  %v1209_v58 = vld [vmem:[#allocation6 + $0x118] sm:$0xff]   ;;  %v1212_v61 = vld [vmem:[#allocation6 + $0x1d0] sm:$0xff]   ;;  %v1216_v1 = vld [vmem:[#allocation6 + $0x1c8] sm:$0xff]  }
  0x3c   :  { %1061 = vmatpush3.bf16.msra.mxu1 %v1178_v19  ;;  %1040 = vmatprep.subr.bf16.mxu0 %v1179_v20  ;;  %v1210_v59 = vld [vmem:[#allocation6 + $0x198] sm:$0xff]   ;;  %v1213_v62 = vld [vmem:[#allocation6 + $0x110] sm:$0xff]   ;;  %v1217_v2 = vld [vmem:[#allocation6 + $0x108] sm:$0xff]  }
  0x3d   :  { %1062 = vmatprep.subr.bf16.mxu1 %v1180_v21  ;;  %v1214_v63 = vld [vmem:[#allocation6 + $0x190] sm:$0xff]   ;;  %v1218_v3 = vld [vmem:[#allocation6 + $0x188] sm:$0xff]   ;;  %v1219_v4 = vld [vmem:[#allocation6 + $0x140] sm:$0xff]  }
  0x3e   :  { %v1220_v5 = vld [vmem:[#allocation6 + $0x1c0] sm:$0xff]   ;;  %v73_v8 = vld [vmem:[#allocation3 + $0x10] sm:$0xff]  ;;  %v74_v12 = vld [vmem:[#allocation3 + $0x18] sm:$0xff] }
  0x3f   :  { %1041 = vmatpush3.bf16.msra.mxu0 %v1181_v22  ;;  %v1221_v6 = vld [vmem:[#allocation6 + $0x100] sm:$0xff]   ;;  %v77_v9 = vld [vmem:[#allocation3 + $0x30] sm:$0xff]  ;;  %v78_v13 = vld [vmem:[#allocation3 + $0x38] sm:$0xff] }
  0x40   :  { %1063 = vmatpush3.bf16.msra.mxu1 %v1182_v23  ;;  %1042 = vmatprep.subr.bf16.mxu0 %v1183_v24  ;;  %v1222_v7 = vld [vmem:[#allocation6 + $0x180] sm:$0xff]   ;;  %v952_v10 = vcombine.low %v73_v8, %v77_v9  ;;  %v953_v11 = vcombine.high %v73_v8, %v77_v9  ;;  %v954_v14 = vcombine.low %v74_v12, %v78_v13  ;;  %v1223_v16 = vld [vmem:[#allocation8 + $0x38] sm:$0xff]   ;;  %v1224_v18 = vld [vmem:[#allocation8 + $0x30] sm:$0xff]  }
  0x41   :  { %1064 = vmatprep.subr.bf16.mxu1 %v1184_v25  ;;  %v955_v15 = vcombine.high %v74_v12, %v78_v13  ;;  %v1225_v19 = vld [vmem:[#allocation8 + $0x28] sm:$0xff]   ;;  %v1226_v20 = vld [vmem:[#allocation8 + $0x20] sm:$0xff]   ;;  %v1227_v21 = vld [vmem:[#allocation8 + $0x18] sm:$0xff]  }
  0x42   :  { %v1228_v22 = vld [vmem:[#allocation8 + $0x10] sm:$0xff]   ;;  %v1229_v23 = vld [vmem:[#allocation8 + $0x8] sm:$0xff]   ;;  %v1230_v24 = vld [vmem:[#allocation8] sm:$0xff]  }
  0x43   :  { %1043 = vmatpush3.bf16.msra.mxu0 %v1185_v26 }
  0x44   :  { %1065 = vmatpush3.bf16.msra.mxu1 %v1186_v27  ;;  %1044 = vmatprep.subr.bf16.mxu0 %v1187_v28 }
  0x45   :  { %1066 = vmatprep.subr.bf16.mxu1 %v1188_v29 }
  0x47   :  { %1045 = vmatpush3.bf16.msra.mxu0 %v1189_v30 }
  0x48   :  { %1067 = vmatpush3.bf16.msra.mxu1 %v1190_v31  ;;  %1074 = vmatprep.subr.bf16.mxu0 %v1191_v40 }
  0x49   :  { %1096 = vmatprep.subr.bf16.mxu1 %v1192_v41 }
  0x4a   :  { %664 = vmatmul.mubr.bf16.vlgmr.msra.gmra.mxu0 %v948_v35 }
  0x4b   :  { %705 = vmatmul.mubr.bf16.vlgmr.msra.gmra.mxu1 %v950_v38  ;;  %1075 = vmatpush3.bf16.msra.mxu0 %v1193_v42 }
  0x4c   :  { %1097 = vmatpush3.bf16.msra.mxu1 %v1194_v43  ;;  %1076 = vmatprep.subr.bf16.mxu0 %v1195_v44 }
  0x4d   :  { %1098 = vmatprep.subr.bf16.mxu1 %v1196_v45  ;;  %745 = vmatprep.mubr.bf16.mxu0 %v953_v11 }
  0x4e   :  { %786 = vmatprep.mubr.bf16.mxu1 %v955_v15 }
  0x4f   :  { %1077 = vmatpush3.bf16.msra.mxu0 %v1197_v46 }
  0x50   :  { %1099 = vmatpush3.bf16.msra.mxu1 %v1198_v47  ;;  %1078 = vmatprep.subr.bf16.mxu0 %v1199_v48 }
  0x51   :  { %1100 = vmatprep.subr.bf16.mxu1 %v1200_v49 }
  0x53   :  { %1079 = vmatpush3.bf16.msra.mxu0 %v1201_v50 }
  0x54   :  { %1101 = vmatpush3.bf16.msra.mxu1 %v1202_v51  ;;  %1080 = vmatprep.subr.bf16.mxu0 %v1203_v52  ;;  %v1020_v52 = vld [vmem:[%s1379_s2] ss:$0 sm:$0xff]  ;;  %s1291_s2 = scalar_lea.vmem %s936_s14, 256 }
  0x55   :  { %1102 = vmatprep.subr.bf16.mxu1 %v1204_v53  ;;  %p1292_p1 = scmp.ne.s32.totalorder %s936_s14, %s1291_s2  ;;  %p1297_p3 = scmp.lt.s32.totalorder %s1291_s2, %s1291_s2 }
  0x57   :  { %1081 = vmatpush3.bf16.msra.mxu0 %v1205_v54  ;;  %p1298_p4 = por %p1297_p3, %p1296_p2 }
  0x58   :  { %1103 = vmatpush3.bf16.msra.mxu1 %v1206_v55  ;;  %1082 = vmatprep.subr.bf16.mxu0 %v1207_v56 }
  0x59   :  { %1104 = vmatprep.subr.bf16.mxu1 %v1208_v57  ;;  %p1299_p5 = pnand %p1298_p4, %p1292_p1 }
  0x5b   :  { %1083 = vmatpush3.bf16.msra.mxu0 %v1209_v58 }
  0x5c   :  { %1105 = vmatpush3.bf16.msra.mxu1 %v1210_v59  ;;  %1084 = vmatprep.subr.bf16.mxu0 %v1211_v60 }
  0x5d   :  { %1106 = vmatprep.subr.bf16.mxu1 %v1212_v61  ;;  %v1021_v61 = vld [vmem:[%s1381_s4] ss:$0 sm:$0xff] }
  0x5f   :  { %1085 = vmatpush3.bf16.msra.mxu0 %v1213_v62 }
  0x60   :  { %1107 = vmatpush3.bf16.msra.mxu1 %v1214_v63  ;;  %1086 = vmatprep.subr.bf16.mxu0 %v1215_v0 }
  0x61   :  { %1108 = vmatprep.subr.bf16.mxu1 %v1216_v1 }
  0x63   :  { %1087 = vmatpush3.bf16.msra.mxu0 %v1217_v2 }
  0x64   :  { %1109 = vmatpush3.bf16.msra.mxu1 %v1218_v3  ;;  %1088 = vmatprep.subr.bf16.mxu0 %v1219_v4 }
  0x65   :  { %1110 = vmatprep.subr.bf16.mxu1 %v1220_v5 }
  0x67   :  { %1089 = vmatpush3.bf16.msra.mxu0 %v1221_v6 }
  0x68   :  { %1111 = vmatpush3.bf16.msra.mxu1 %v1222_v7  ;;  %1127 = vmatprep.subr.bf16.mxu0 %v1324_v17 }
  0x6a   :  { %746 = vmatmul.mubr.bf16.vlgmr.msra.gmra.mxu0 %v952_v10 }
  0x6b   :  { %787 = vmatmul.mubr.bf16.vlgmr.msra.gmra.mxu1 %v954_v14  ;;  %1128 = vmatpush3.bf16.msra.mxu0 %v1223_v16 }
  0x6c   :  { %1129 = vmatprep.subr.bf16.mxu0 %v1324_v17  ;;  %1143 = vmatprep.mubr.msk.bf16.mxu0 %vm1325_vm0, %v1324_v17 }
  0x6f   :  { %1130 = vmatpush3.bf16.msra.mxu0 %v1224_v18 }
  0x70   :  { %1131 = vmatprep.subr.bf16.mxu0 %v1324_v17 }
  0x73   :  { %1132 = vmatpush3.bf16.msra.mxu0 %v1225_v19 }
  0x74   :  { %1133 = vmatprep.subr.bf16.mxu0 %v1324_v17 }
  0x77   :  { %1134 = vmatpush3.bf16.msra.mxu0 %v1226_v20 }
  0x78   :  { %1135 = vmatprep.subr.bf16.mxu0 %v1324_v17 }
  0x7b   :  { %1136 = vmatpush3.bf16.msra.mxu0 %v1227_v21 }
  0x7c   :  { %1137 = vmatprep.subr.bf16.mxu0 %v1324_v17 }
  0x7f   :  { %1138 = vmatpush3.bf16.msra.mxu0 %v1228_v22 }
  0x80   :  { %1139 = vmatprep.subr.bf16.mxu0 %v1324_v17 }
  0x83   :  { %1140 = vmatpush3.bf16.msra.mxu0 %v1229_v23 }
  0x84   :  { %1141 = vmatprep.subr.bf16.mxu0 %v1324_v17 }
  0x87   :  { %1142 = vmatpush3.bf16.msra.mxu0 %v1230_v24 }
 0x10a   :  { %v1046_v25 = vpop.f32.mrf.mxu0 }
 0x10b   :  { %v1068_v26 = vpop.f32.mrf.mxu1 }
 0x10c   :  { %v1047_v27 = vpop.f32.mrf.mxu0 }
 0x10d   :  { %v1069_v28 = vpop.f32.mrf.mxu1  ;;  %v1048_v32 = vadd.f32 %v1047_v27, %v1046_v25 }
 0x10e   :  { %v1049_v29 = vpop.f32.mrf.mxu0  ;;  %v1070_v33 = vadd.f32 %v1069_v28, %v1068_v26 }
 0x10f   :  { %v1071_v30 = vpop.f32.mrf.mxu1 }
 0x110   :  { %v1050_v31 = vpop.f32.mrf.mxu0  ;;  %v707_v38 = vadd.f32 %v1070_v33, %v1048_v32 }
 0x111   :  { %v1072_v34 = vpop.f32.mrf.mxu1  ;;  %v1051_v39 = vadd.f32 %v1050_v31, %v1049_v29 }
 0x112   :  { %v1073_v40 = vadd.f32 %v1072_v34, %v1071_v30 }
 0x114   :  { %v710_v48 = vadd.f32 %v1073_v40, %v1051_v39 }
 0x12a   :  { %v1090_v35 = vpop.f32.mrf.mxu0 }
 0x12b   :  { %v1112_v36 = vpop.f32.mrf.mxu1 }
 0x12c   :  { %v1091_v37 = vpop.f32.mrf.mxu0 }
 0x12d   :  { %v1092_v41 = vadd.f32 %v1091_v37, %v1090_v35  ;;  %v1113_v42 = vpop.f32.mrf.mxu1 }
 0x12e   :  { %v1093_v43 = vpop.f32.mrf.mxu0  ;;  %v1114_v45 = vadd.f32 %v1113_v42, %v1112_v36 }
 0x12f   :  { %v748_v44 = vadd.f32 %v1092_v41, %v707_v38  ;;  %v1115_v46 = vpop.f32.mrf.mxu1 }
 0x130   :  { %v1094_v47 = vpop.f32.mrf.mxu0 }
 0x131   :  { %v789_v49 = vadd.f32 %v1114_v45, %v748_v44  ;;  %v1095_v50 = vadd.f32 %v1094_v47, %v1093_v43  ;;  %v1116_v51 = vpop.f32.mrf.mxu1 }
 0x132   :  { %v1117_v54 = vadd.f32 %v1116_v51, %v1115_v46 }
 0x133   :  { %v751_v53 = vadd.f32 %v1095_v50, %v710_v48  ;;  %v811_v55 = vadd.f32 %v1020_v52, %v789_v49 }
 0x135   :  { %v792_v56 = vadd.f32 %v1117_v54, %v751_v53  ;;  %v813_v58 = vmax.f32 %v811_v55, 0.0 }
 0x137   :  { %v812_v57 = vadd.f32 %v1020_v52, %v792_v56 }
 0x139   :  { %v814_v59 = vmax.f32 %v812_v57, 0.0 }
 0x13b   :  { %v815_v60 = vpack.c.bf16 %v814_v59, %v813_v58 }
 0x13d   :  { %1144 = vmatmul.mubr.bf16.vlgmr.msra.gmra.mxu0 %v815_v60 }
 0x1fd   :  { %v921_v62 = vpop.f32.mrf.mxu0 }
 0x1fe   :  { %v922_v63 = vadd.f32 %v1021_v61, %v921_v62 }
 0x1ff   :  { %v1145_v0 = vpop.f32.mrf.mxu0 }
 0x200   :  { %928 = vst [vmem:[#allocation9] sm:$0xff] %v922_v63 }
 0x201   :  { %v924_v1 = vpop.f32.mrf.mxu0 }
 0x202   :  { %v925_v2 = vadd.f32 %v1021_v61, %v924_v1 }
 0x203   :  { %v1146_v3 = vpop.f32.mrf.mxu0 }
 0x204   :  { %929 = vst [vmem:[#allocation9 + $0x8] sm:$0xff] %v925_v2 }
 0x205   :  { %1302 = shalt.err (!%p1299_p5)
}
 0x206   :  { %s1327_s15 = smov 128   ;;  %s1328_s4 = smov 8  }
 0x207   :  { %941 = dma.vmem_to_hbm [thread:$0]  %s936_s14, 256, %s1382_s5, [#allocation5], %s1327_s15, %s1327_s15, %s1328_s4  }
 0x208   :  { %1315 = dma.done.wait [#allocation5], 256  }
 0x209   :  { %1316 = vsyncadd [#allocation5], 4294967040 }
 0x20a   :  { %945 = vsyncpa [#allocation4], 1 }
 0x20b   :  { %946 = vsyncpa [#allocation7], 1 }
 0x20c   :  { %947 = vsyncpa [#allocation5], 1 }

</bundles_post_ra>
